<compile_context>
chip_gen: v6e
topology: v6e:2x2x1
jax: 0.10.0
libtpu: 0.0.40
codegen_flags: <defaults>
</compile_context>

<pallas_src>
import functools
import math

import jax
import jax.numpy as jnp
from jax.experimental import pallas as pl
from jax.experimental.pallas import tpu as pltpu


# --------------------------------------------------------------------------
# VMEM budget helpers (generation aware)
# --------------------------------------------------------------------------
def _vmem_caps():
    phys = 64 * 1024 * 1024                      # conservative default (v7x)
    try:
        info = pltpu.get_tpu_info()
        phys = int(getattr(info, "vmem_capacity_bytes", phys))
    except Exception:
        pass
    # ~72% of physical as working-set budget: ~92 MiB on v5e/v6e (128 MiB),
    # ~46 MiB on v7x (64 MiB) — leaves headroom for compiler scratch.
    return phys, int(phys * 0.72)


def _pick_tile(P, max_tile):
    """Lane-dense pixel tile: full P if it fits, else a multiple of 128 that
    (preferably) divides P so the last tile is not a masked partial store."""
    if P <= max_tile:
        return P
    max_tile = max((max_tile // 128) * 128, 128)
    t = max_tile
    while t >= 128:
        if P % t == 0:
            return t
        t -= 128
    return max_tile


# --------------------------------------------------------------------------
# Kernel 1: tiled modulate + demod + matmul (kernel=1 path and im2col fallback)
# --------------------------------------------------------------------------
def _mod_matmul_kernel(y_ref, x_ref, w_ref, out_ref, wm_ref, *, demod, eps,
                       cache_wm):
    # y_ref : (1, 1, K)   modulation (expanded over the k*k taps)
    # x_ref : (1, K, Tp)  pixels / im2col patches for this (batch, pixel tile)
    # w_ref : (O, K)      flattened base weight (constant block)
    # out   : (1, O, Tp)
    # wm_ref: (O, K)      per-batch modulated-weight cache (input dtype)
    def modulated_weights():
        y = y_ref[0].astype(jnp.float32)            # (1, K)
        w = w_ref[...].astype(jnp.float32)          # (O, K)
        wm = w * (y + 1.0)                          # modulation (f32 VPU math)
        if demod:
            d = jax.lax.rsqrt(jnp.sum(wm * wm, axis=1, keepdims=True) + eps)
            wm = wm * d                             # demodulation
        return wm.astype(x_ref.dtype)               # native MXU operand dtype

    if cache_wm:
        # Hoist modulation/demod out of the pixel loop: compute once per batch.
        @pl.when(pl.program_id(1) == 0)
        def _():
            wm_ref[...] = modulated_weights()
        wm = wm_ref[...]
    else:
        wm = modulated_weights()

    out_ref[0] = jnp.dot(wm, x_ref[0],
                         preferred_element_type=jnp.float32).astype(out_ref.dtype)


def _tiled_mod_matmul(x_cols, y_exp, w_flat, *, demod, eps, max_tile_pix=None):
    """x_cols: (b, K, P); y_exp: (b, 1, K); w_flat: (O, K) -> (b, O, P)."""
    b, K, P = x_cols.shape
    O = w_flat.shape[0]
    bx = x_cols.dtype.itemsize
    bw = w_flat.dtype.itemsize
    phys, budget = _vmem_caps()

    # Fixed VMEM (independent of the pixel tile): double-buffered weight block,
    # y block, the wm scratch and some slack.
    # TODO(synk): single-buffer the constant weight block (memory_space=pl.ANY +
    # one manual DMA) to reclaim O*K*bw of VMEM on v7x at very large O*K.
    fixed = 2 * O * K * bw + 2 * K * y_exp.dtype.itemsize + O * K * bx + (2 << 20)
    per_pix = 2 * (K * bx + O * bx)                 # double-buffered x + out streams
    max_tile = max((budget - fixed) // per_pix, 128)
    if max_tile_pix is not None:
        max_tile = min(max_tile, int(max_tile_pix))
    tile = _pick_tile(P, max_tile)
    n_pix = pl.cdiv(P, tile)
    # TODO(synk): for K so large that even a 128-pixel tile blows the budget,
    # add K as a trailing "arbitrary" grid axis with an f32 accumulator instead
    # of shrinking the pixel tile further.

    # Cache modulated weights per batch only when the batch axis still gives
    # v7x megacore a parallel axis of size >= 2.
    cache_wm = (n_pix > 1) and (b >= 2)

    need = fixed + per_pix * tile
    vmem_limit = int(min(phys * 0.94, max(need + (8 << 20), 32 << 20)))

    kernel_fn = functools.partial(_mod_matmul_kernel, demod=demod, eps=eps,
                                  cache_wm=cache_wm)
    return pl.pallas_call(
        kernel_fn,
        grid=(b, n_pix),
        in_specs=[
            pl.BlockSpec((1, 1, K), lambda bi, pi: (bi, 0, 0)),       # y_exp
            pl.BlockSpec((1, K, tile), lambda bi, pi: (bi, 0, pi)),   # x_cols
            pl.BlockSpec((O, K), lambda bi, pi: (0, 0)),              # w_flat
        ],
        out_specs=pl.BlockSpec((1, O, tile), lambda bi, pi: (bi, 0, pi)),
        out_shape=jax.ShapeDtypeStruct((b, O, P), x_cols.dtype),
        scratch_shapes=[pltpu.VMEM((O, K), x_cols.dtype)],
        compiler_params=pltpu.CompilerParams(
            dimension_semantics=("parallel",
                                 "arbitrary" if cache_wm else "parallel"),
            vmem_limit_bytes=vmem_limit),
    )(y_exp, x_cols, w_flat)


# --------------------------------------------------------------------------
# Kernel 2: fused k>1 conv (whole padded image resident in VMEM, k*k taps as
# static lane-offset slices + accumulating matmuls — no HBM im2col)
# --------------------------------------------------------------------------
def _fused_conv_kernel(y_ref, x_ref, w_ref, out_ref, acc_ref, *,
                       demod, eps, k, dilation, wp):
    # y_ref : (1, 1, C)          modulation
    # x_ref : (1, C, Lx)         flattened padded image (+ tail padding)
    # w_ref : (k*k, O, C)        base weight, tap-major
    # out   : (1, O, Pc)         output "canvas" (row stride = padded width wp)
    # acc   : (O, Pc) f32        accumulator scratch
    kk = k * k
    Pc = out_ref.shape[2]
    ymod = y_ref[0].astype(jnp.float32) + 1.0                 # (1, C)

    d = None
    if demod:
        O = w_ref.shape[1]
        ssq = jnp.zeros((O, 1), jnp.float32)
        for t in range(kk):
            wt = w_ref[t].astype(jnp.float32) * ymod          # (O, C)
            ssq = ssq + jnp.sum(wt * wt, axis=1, keepdims=True)
        d = jax.lax.rsqrt(ssq + eps)                          # (O, 1)

    acc_ref[...] = jnp.zeros_like(acc_ref)
    for t in range(kk):
        kh, kw = t // k, t % k
        off = (kh * wp + kw) * dilation                        # static tap shift
        wt = w_ref[t].astype(jnp.float32) * ymod
        if demod:
            wt = wt * d
        xs = x_ref[0, :, off:off + Pc]                         # (C, Pc) static slice
        acc_ref[...] += jnp.dot(wt.astype(x_ref.dtype), xs,
                                preferred_element_type=jnp.float32)
    out_ref[0] = acc_ref[...].astype(out_ref.dtype)


def _fused_small_conv(x, y, weight, *, demod, eps, dilation, padding):
    """k>1 path without HBM im2col. Returns None if it doesn't fit VMEM."""
    b, C, H, W = x.shape
    O, _, k, _ = weight.shape
    eff = dilation * (k - 1)
    Hp, Wp = H + 2 * padding, W + 2 * padding
    H_out, W_out = Hp - eff, Wp - eff
    if H_out <= 0 or W_out <= 0:
        return None
    Pc = H_out * Wp                       # canvas pixels (padded row stride)
    max_off = eff * (Wp + 1)              # largest tap shift
    Lx = Pc + max_off                     # == Hp*Wp + eff
    bx = x.dtype.itemsize
    bw = weight.dtype.itemsize

    need = (2 * C * Lx * bx               # double-buffered x image
            + 2 * k * k * O * C * bw      # double-buffered weight block
            + 2 * O * Pc * bx             # double-buffered output canvas
            + O * Pc * 4                  # f32 accumulator scratch
            + 8 * O * C * 4               # in-kernel temporaries
            + (2 << 20))
    phys, budget = _vmem_caps()
    if need > budget:
        return None                       # too big for whole-image path

    x_pad = jnp.pad(x, ((0, 0), (0, 0), (padding, padding), (padding, padding)))
    x_flat = x_pad.reshape(b, C, Hp * Wp)
    if Lx > Hp * Wp:                      # tail pad so every tap slice is in-bounds
        x_flat = jnp.pad(x_flat, ((0, 0), (0, 0), (0, Lx - Hp * Wp)))
    w_r = jnp.transpose(weight, (2, 3, 0, 1)).reshape(k * k, O, C)
    y_r = y[:, None, :]

    vmem_limit = int(min(phys * 0.94, max(need + (8 << 20), 32 << 20)))
    kernel_fn = functools.partial(_fused_conv_kernel, demod=demod, eps=eps,
                                  k=k, dilation=dilation, wp=Wp)
    out_canvas = pl.pallas_call(
        kernel_fn,
        grid=(b,),
        in_specs=[
            pl.BlockSpec((1, 1, C), lambda bi: (bi, 0, 0)),        # y
            pl.BlockSpec((1, C, Lx), lambda bi: (bi, 0, 0)),       # x (flat, padded)
            pl.BlockSpec((k * k, O, C), lambda bi: (0, 0, 0)),     # weight
        ],
        out_specs=pl.BlockSpec((1, O, Pc), lambda bi: (bi, 0, 0)),
        out_shape=jax.ShapeDtypeStruct((b, O, Pc), x.dtype),
        scratch_shapes=[pltpu.VMEM((O, Pc), jnp.float32)],
        compiler_params=pltpu.CompilerParams(
            dimension_semantics=("parallel",),
            vmem_limit_bytes=vmem_limit),
    )(y_r, x_flat, w_r)
    # Drop the horizontal overhang columns of the canvas.
    return out_canvas.reshape(b, O, H_out, Wp)[:, :, :, :W_out]


# --------------------------------------------------------------------------
# im2col fallback for k>1 images too large for the whole-image VMEM path.
# TODO(synk): replace with a row-halo tiled kernel so the k*k-times larger
# patch tensor is never materialised in HBM for huge images either.
# --------------------------------------------------------------------------
def _im2col(x, kernel, dilation, padding):
    b, c, h, w = x.shape
    xp = jnp.pad(x, ((0, 0), (0, 0), (padding, padding), (padding, padding)))
    h_out = h + 2 * padding - dilation * (kernel - 1)
    w_out = w + 2 * padding - dilation * (kernel - 1)
    cols = []
    for di in range(kernel):
        for dj in range(kernel):
            cols.append(xp[:, :,
                           di * dilation:di * dilation + h_out,
                           dj * dilation:dj * dilation + w_out])
    patches = jnp.stack(cols, axis=2)              # (b, c, k*k, h_out, w_out)
    return patches.reshape(b, c * kernel * kernel, h_out * w_out), (h_out, w_out)


# --------------------------------------------------------------------------
# Public wrapper
# --------------------------------------------------------------------------
def conv2d_mod(x, y, weight, *, demod=True, stride=1, dilation=1, eps=1e-8,
               max_tile_pix=None, force_im2col=False):
    """x: (b, in_chan, h, w); y: (b, in_chan); weight: (out_chan, in_chan, k, k)."""
    b, cin, h, w_sp = x.shape
    out_chan, in_chan, k, _ = weight.shape
    assert cin == in_chan
    if stride != 1:
        # TODO(synk): strided grouped-conv output indexing not implemented here.
        raise NotImplementedError("conv2d_mod Pallas path supports stride=1 only")

    padding = ((h - 1) * (stride - 1) + dilation * (k - 1)) // 2

    if k == 1:
        x_cols = x.reshape(b, in_chan, h * w_sp)
        y_exp = y[:, None, :]
        w_flat = weight.reshape(out_chan, in_chan)
        out = _tiled_mod_matmul(x_cols, y_exp, w_flat, demod=demod, eps=eps,
                                max_tile_pix=max_tile_pix)
        return out.reshape(b, out_chan, h, w_sp)

    # k > 1: fused whole-image path (no HBM im2col) when it fits VMEM.
    if not force_im2col:
        out = _fused_small_conv(x, y, weight, demod=demod, eps=eps,
                                dilation=dilation, padding=padding)
        if out is not None:
            return out

    # Fallback: HBM im2col + the tiled modulate-matmul kernel.
    x_cols, (h_out, w_out) = _im2col(x, k, dilation, padding)
    K = in_chan * k * k
    w_flat = weight.reshape(out_chan, K)
    y_exp = jnp.repeat(y, k * k, axis=1)[:, None, :]
    out = _tiled_mod_matmul(x_cols, y_exp, w_flat, demod=demod, eps=eps,
                            max_tile_pix=max_tile_pix)
    return out.reshape(b, out_chan, h_out, w_out)


# --------------------------------------------------------------------------
# Pure-JAX reference (mirrors the torch forward, incl. grouped conv reshapes)
# --------------------------------------------------------------------------
def conv2dmod_ref(x, y, weight, *, demod=True, stride=1, dilation=1, eps=1e-8):
    b, _, h, w_sp = x.shape
    out_chan, in_chan, k, _ = weight.shape
    w1 = y[:, None, :, None, None]
    w2 = weight[None, :, :, :, :]
    weights = w2 * (w1 + 1.0)
    if demod:
        d = jax.lax.rsqrt(jnp.sum(weights ** 2, axis=(2, 3, 4), keepdims=True) + eps)
        weights = weights * d
    x_r = x.reshape(1, -1, h, w_sp)
    weights = weights.reshape(b * out_chan, in_chan, k, k)
    padding = ((h - 1) * (stride - 1) + dilation * (k - 1)) // 2
    out = jax.lax.conv_general_dilated(
        x_r, weights,
        window_strides=(stride, stride),
        padding=[(padding, padding), (padding, padding)],
        rhs_dilation=(dilation, dilation),
        dimension_numbers=("NCHW", "OIHW", "NCHW"),
        feature_group_count=b,
        precision=jax.lax.Precision.HIGHEST)
    return out.reshape(b, out_chan, out.shape[-2], out.shape[-1])


# --------------------------------------------------------------------------
# Deterministic init matching nn.init.kaiming_normal_(a=0, fan_in, leaky_relu)
# --------------------------------------------------------------------------
def kaiming_normal(key, shape):
    out_chan, in_chan, kh, kw = shape
    fan_in = in_chan * kh * kw
    gain = math.sqrt(2.0 / (1.0 + 0.0 ** 2))
    std = gain / math.sqrt(fan_in)
    return jax.random.normal(key, shape, dtype=jnp.float32) * std


# --------------------------------------------------------------------------
if __name__ == "__main__":
    key = jax.random.PRNGKey(0)
    k_x, k_y, k_w1, k_w3 = jax.random.split(key, 4)

    B, CIN, COUT, H, W = 2, 4, 8, 16, 16
    x = jax.random.normal(k_x, (B, CIN, H, W), dtype=jnp.float32)
    y = jax.random.normal(k_y, (B, CIN), dtype=jnp.float32)
    w1x1 = kaiming_normal(k_w1, (COUT, CIN, 1, 1))
    w3x3 = kaiming_normal(k_w3, (COUT, CIN, 3, 3))

    # 1) default Conv2DMod configuration: kernel=1, demod=True (f32)
    out1 = conv2d_mod(x, y, w1x1, demod=True)
    jax.block_until_ready(out1)
    ref1 = conv2dmod_ref(x, y, w1x1, demod=True)
    assert out1.shape == (B, COUT, H, W) and out1.dtype == x.dtype
    assert jnp.allclose(out1, ref1, atol=2e-3, rtol=2e-3), "kernel=1 mismatch"

    # 2) forced multi-pixel-tile run (exercises per-batch wm caching path)
    out1t = conv2d_mod(x, y, w1x1, demod=True, max_tile_pix=128)
    assert jnp.allclose(out1t, ref1, atol=2e-3, rtol=2e-3), "tiled kernel=1 mismatch"

    # 3) kernel=3 "same" padding via the fused whole-image path (no HBM im2col)
    out3 = conv2d_mod(x, y, w3x3, demod=True)
    jax.block_until_ready(out3)
    ref3 = conv2dmod_ref(x, y, w3x3, demod=True)
    assert out3.shape == (B, COUT, H, W)
    assert jnp.allclose(out3, ref3, atol=2e-3, rtol=2e-3), "kernel=3 mismatch"

    # 4) kernel=3 with dilation=2
    out3d = conv2d_mod(x, y, w3x3, demod=True, dilation=2)
    ref3d = conv2dmod_ref(x, y, w3x3, demod=True, dilation=2)
    assert jnp.allclose(out3d, ref3d, atol=2e-3, rtol=2e-3), "dilation=2 mismatch"

    # 5) kernel=3 via the im2col fallback (large-image escape hatch)
    out3f = conv2d_mod(x, y, w3x3, demod=True, force_im2col=True)
    assert jnp.allclose(out3f, ref3, atol=2e-3, rtol=2e-3), "im2col fallback mismatch"

    # 6) no-demod variant
    out_nd = conv2d_mod(x, y, w1x1, demod=False)
    ref_nd = conv2dmod_ref(x, y, w1x1, demod=False)
    assert jnp.allclose(out_nd, ref_nd, atol=2e-3, rtol=2e-3), "demod=False mismatch"

    # 7) bf16 I/O path (native MXU operands; f32 modulation/demod + f32 accum)
    xb, yb = x.astype(jnp.bfloat16), y.astype(jnp.bfloat16)
    w1b, w3b = w1x1.astype(jnp.bfloat16), w3x3.astype(jnp.bfloat16)
    ob1 = conv2d_mod(xb, yb, w1b, demod=True)
    ob3 = conv2d_mod(xb, yb, w3b, demod=True)
    jax.block_until_ready((ob1, ob3))
    assert ob1.dtype == jnp.bfloat16 and ob3.dtype == jnp.bfloat16
    rb1 = conv2dmod_ref(xb.astype(jnp.float32), yb.astype(jnp.float32),
                        w1b.astype(jnp.float32), demod=True)
    rb3 = conv2dmod_ref(xb.astype(jnp.float32), yb.astype(jnp.float32),
                        w3b.astype(jnp.float32), demod=True)
    assert jnp.allclose(ob1.astype(jnp.float32), rb1, atol=5e-2, rtol=5e-2), \
        "bf16 kernel=1 mismatch"
    assert jnp.allclose(ob3.astype(jnp.float32), rb3, atol=5e-2, rtol=5e-2), \
        "bf16 kernel=3 mismatch"

    print("KERNEL_OK")
</pallas_src>

<mosaic_0001>
module attributes {stable_mosaic.version = 11 : i64} {
  func.func @_mod_matmul_kernel(%arg0: i32, %arg1: i32, %arg2: memref<1x1x4xf32, #tpu.memory_space<vmem>>, %arg3: memref<1x4x256xf32, #tpu.memory_space<vmem>>, %arg4: memref<8x4xf32, #tpu.memory_space<vmem>>, %arg5: memref<1x8x256xf32, #tpu.memory_space<vmem>>, %arg6: memref<8x4xf32, #tpu.memory_space<vmem>>) attributes {dimension_semantics = [#tpu.dimension_semantics<parallel>, #tpu.dimension_semantics<parallel>], iteration_bounds = array<i64: 2, 1>, scalar_prefetch = 0 : i64, scratch_operands = 1 : i64, tpu.core_type = #tpu.core_type<tc>, window_params = [{transform_indices = @transform_0, window_bounds = array<i64: 1, 1, 4>}, {transform_indices = @transform_1, window_bounds = array<i64: 1, 4, 256>}, {pipeline_mode = #tpu.pipeline_mode<synchronous>, transform_indices = @transform_2, window_bounds = array<i64: 8, 4>}, {transform_indices = @transform_3, window_bounds = array<i64: 1, 8, 256>}]} {
    %c0 = arith.constant 0 : index
    %c0_0 = arith.constant 0 : index
    %c0_1 = arith.constant 0 : index
    %0 = vector.load %arg2[%c0, %c0_0, %c0_1] : memref<1x1x4xf32, #tpu.memory_space<vmem>>, vector<1x1x4xf32>
    %1 = vector.shape_cast %0 : vector<1x1x4xf32> to vector<1x4xf32>
    %c0_2 = arith.constant 0 : index
    %c0_3 = arith.constant 0 : index
    %2 = vector.load %arg4[%c0_2, %c0_3] : memref<8x4xf32, #tpu.memory_space<vmem>>, vector<8x4xf32>
    %cst = arith.constant 1.000000e+00 : f32
    %3 = vector.broadcast %cst : f32 to vector<1x4xf32>
    %4 = arith.addf %1, %3 : vector<1x4xf32>
    %5 = vector.broadcast %4 : vector<1x4xf32> to vector<8x4xf32>
    %6 = arith.mulf %2, %5 : vector<8x4xf32>
    %7 = arith.mulf %6, %6 : vector<8x4xf32>
    %cst_4 = arith.constant dense<0.000000e+00> : vector<8xf32>
    %8 = vector.multi_reduction <add>, %7, %cst_4 [1] : vector<8x4xf32> to vector<8xf32>
    %9 = vector.shape_cast %8 : vector<8xf32> to vector<8x1xf32>
    %cst_5 = arith.constant 9.99999993E-9 : f32
    %10 = vector.broadcast %cst_5 : f32 to vector<8x1xf32>
    %11 = arith.addf %9, %10 : vector<8x1xf32>
    %12 = math.rsqrt %11 : vector<8x1xf32>
    %13 = vector.broadcast %12 : vector<8x1xf32> to vector<8x4xf32>
    %14 = arith.mulf %6, %13 : vector<8x4xf32>
    %c0_6 = arith.constant 0 : index
    %c0_7 = arith.constant 0 : index
    %c0_8 = arith.constant 0 : index
    %15 = vector.load %arg3[%c0_6, %c0_7, %c0_8] : memref<1x4x256xf32, #tpu.memory_space<vmem>>, vector<1x4x256xf32>
    %16 = vector.shape_cast %15 : vector<1x4x256xf32> to vector<4x256xf32>
    %cst_9 = arith.constant dense<0.000000e+00> : vector<8x256xf32>
    %17 = tpu.matmul %14, %16, %cst_9 {dimension_numbers = #tpu.dot_dimension_numbers<[1], [0], [0], [1], [0, 0, 1, 1], [], []>} : vector<8x4xf32>, vector<4x256xf32>, vector<8x256xf32> -> vector<8x256xf32>
    %c0_10 = arith.constant 0 : index
    %c0_11 = arith.constant 0 : index
    %c0_12 = arith.constant 0 : index
    %18 = vector.load %arg5[%c0_10, %c0_11, %c0_12] : memref<1x8x256xf32, #tpu.memory_space<vmem>>, vector<1x8x256xf32>
    %19 = vector.shape_cast %18 : vector<1x8x256xf32> to vector<8x256xf32>
    %20 = vector.shape_cast %17 : vector<8x256xf32> to vector<1x8x256xf32>
    tpu.vector_store %arg5[%c0_10, %c0_11, %c0_12], %20 {strides = array<i32>} : memref<1x8x256xf32, #tpu.memory_space<vmem>>, vector<1x8x256xf32>,
    return
  }
  func.func @transform_0(%arg0: i32, %arg1: i32) -> (i32, i32, i32) {
    %c0_i32 = arith.constant 0 : i32
    %c0_i32_0 = arith.constant 0 : i32
    %c0_i32_1 = arith.constant 0 : i32
    return %arg0, %c0_i32, %c0_i32_0 : i32, i32, i32
  }
  func.func @transform_1(%arg0: i32, %arg1: i32) -> (i32, i32, i32) {
    %c0_i32 = arith.constant 0 : i32
    %c0_i32_0 = arith.constant 0 : i32
    return %arg0, %c0_i32, %arg1 : i32, i32, i32
  }
  func.func @transform_2(%arg0: i32, %arg1: i32) -> (i32, i32) {
    %c0_i32 = arith.constant 0 : i32
    %c0_i32_0 = arith.constant 0 : i32
    %c0_i32_1 = arith.constant 0 : i32
    return %c0_i32, %c0_i32_0 : i32, i32
  }
  func.func @transform_3(%arg0: i32, %arg1: i32) -> (i32, i32, i32) {
    %c0_i32 = arith.constant 0 : i32
    %c0_i32_0 = arith.constant 0 : i32
    return %arg0, %c0_i32, %arg1 : i32, i32, i32
  }
}

</mosaic_0001>

<bundles_post_ra>
// kernel: tpu_custom_call.1
= control target key start
LH: loop header
LB: loop body
LE: loop exit
PB: predicated region body
PF: predicated region fallthrough
CT: control target
= control target key end

     0   :  { %8 = vsyncpa [#allocation4], 0  ;;  %s803_s0 = inlined_call_operand.vmem [shape: f32[2,1,4], index: 0, kind: input, shape index: {}]   ;;  %s804_s1 = inlined_call_operand.hbm [shape: f32[2,4,256], index: 1, kind: input, shape index: {}]   ;;  %s805_s2 = inlined_call_operand.vmem [shape: f32[8,4], index: 2, kind: input, shape index: {}]   ;;  %s806_s3 = inlined_call_operand.hbm [shape: f32[2,8,256], index: 3, kind: output, shape index: {}]  }
   0x1   :  { %10 = vsyncpa [#allocation4 + $0x1], 0 }
   0x2   :  { %11 = vsyncpa [#allocation5], 0 }
   0x3   :  { %13 = vsyncpa [#allocation5 + $0x1], 0  ;;  %s652_s12 = smov 0   ;;  %s654_s13 = smov 0  }
   0x4   :  { %s656_s14 = smov 0   ;;  %s658_s15 = smov 0  }
   0x5   :  { %s660_s16 = smov 0   ;;  %s662_s17 = smov 0  }
   0x6 LB: > { %s433_s18 = sadd.s32 4294967295, %s627_s17   ;;  %s434_s19 = sadd.s32 4294967294, %s627_s17   ;;  %s627_s17 = sphi %s662_s17, %s19_s17   ;;  %s623_s16 = sphi %s660_s16, %s818_s16   ;;  %s619_s15 = sphi %s658_s15, %s817_s15   ;;  %s615_s14 = sphi %s656_s14, %s816_s14   ;;  %s611_s13 = sphi %s654_s13, %s815_s13   ;;  %s607_s12 = sphi %s652_s12, %s814_s12  }
   0x7   : > { %s31_s20 = sadd.s32 1, %s623_s16  ;;  %s66_s21 = sadd.s32 1, %s615_s14 }
   0x8   : > { %p33_p0 = scmp.ge.s32.totalorder %s31_s20, 2  ;;  %p73_p1 = scmp.ne.s32.totalorder %s615_s14, %s611_s13 }
   0x9   : > { %p74_p2 = scmp.eq.s32.totalorder %s627_s17, 0  ;;  %p79_p3 = scmp.ne.s32.totalorder %s611_s13, %s607_s12 }
   0xa   : > { %s820_s20 = smov (%p33_p0, %s31_s20), 0  ;;  %p80_p5 = scmp.eq.s32.totalorder %s433_s18, 0 }
   0xb   : > { %p693_p4 = por %p74_p2, %p73_p1  ;;  %s61_s23 = ssub.s32 %s623_s16, %s820_s20 }
   0xc   : > { %p126_p6 = scmp.eq.s32.totalorder %s433_s18, 1  ;;  %p64_p7 = scmp.eq.s32.totalorder %s61_s23, 0 }
   0xd   : > { %p699_p8 = por %p80_p5, %p79_p3  ;;  %p132_p10 = scmp.eq.s32.totalorder %s434_s19, 1 }
   0xe   : > { %p703_p9 = por %p126_p6, %p73_p1  ;;  %p465_p13 = scmp.lt.s32.totalorder %s627_s17, 2 }
   0xf   : > { %s708_s26 = scalar_select %p64_p7, %s615_s14, %s66_s21  }
  0x10   : > { %p710_p11 = por %p132_p10, %p79_p3  ;;  %s161_s28 = sand.u32 1, %s615_s14  }
  0x11   : > { %s437_s29 = sshll.u32 %s161_s28, 3  ;;  %s451_s30 = sshll.u32 %s623_s16, 7 }
  0x12   : > { %s810_s27 = scalar_select %p710_p11, 1, 0 }
  0x13   : > { %s173_s6 = scalar_lea.hbm %s804_s1, %s451_s30  ;;  %s165_s7 = scalar_lea.vmem [#allocation3], %s437_s29 }
  0x14   : > { %s175_s8 = sshll.u32 %s165_s7, 4  ;;  %p723_p0 = pnand %p465_p13, %p693_p4  ;;  %s176_s8 = int_to_ptr.vmem [resolvable:$true] %s175_s8 }
  0x15   : > { %p440_p1 = scmp.ge.s32.totalorder %s627_s17, 1  ;;  %p180_p2 = scmp.lt.s32.totalorder %s627_s17, 3 }
  0x16   : > { %s162_s10 = scalar_lea.sflag [#allocation4], %s161_s28  ;;  %p521_p3 = pneg %p723_p0 }
  0x17   : > { %s532_s11 = scalar_lea.vmem %s176_s8, 128  ;;  %s629_s18 = smov [#allocation3]  }
  0x18   : > { %p533_p5 = scmp.ne.s32.totalorder %s176_s8, %s532_s11  ;;  %s537_s19 = sshll.u32 %s629_s18, 4  ;;  %s538_s19 = int_to_ptr.vmem [resolvable:$false] %s537_s19 }
  0x19   : > { %s539_s21 = scalar_lea.vmem %s538_s19, 256  ;;  %p540_p10 = scmp.lt.s32.totalorder %s176_s8, %s538_s19 }
  0x1a   : > { %p535_p6 = pnand %p533_p5, %p521_p3  ;;  %p541_p12 = scmp.lt.s32.totalorder %s539_s21, %s532_s11 }
  0x1c   : > { %p536_p7 = pneg %p535_p6  ;;  %p542_p4 = por %p541_p12, %p540_p10 }
  0x1e   : > { %p543_p13 = pnand %p542_p4, %p536_p7 }
  0x20   : > { %546 = shalt.err (!%p543_p13)
}
  0x21   : > { %460 = dma.hbm_to_vmem [thread:$0]  (!%p723_p0), %s173_s6, 128, %s176_s8, %s162_s10  }
  0x22   : > { %p181_p11 = pnand %p440_p1, %p180_p2 }
  0x23   : > { %s738_s22 = sand.u32 (!%p181_p11), 1, %s611_s13  }
  0x24   : > { %184 = sbr.rel (%p181_p11) target bundleno = 421 (0x1a5), region = 32  ;;  %s441_s23 = sshll.u32 (!%p181_p11), %s738_s22, 3 }
  0x25   : > { %s187_s28 = scalar_lea.sflag (!%p181_p11), [#allocation4], %s738_s22  ;;  %s190_s29 = scalar_lea.vmem (!%p181_p11), [#allocation3], %s441_s23 }
  0x29   : > { %598 = dma.done.wait (%p699_p8), %s187_s28, 128  }
  0x2a   : > { %600 = vsyncadd (%p699_p8), %s187_s28, 4294967168  ;;  %p216_p12 = scmp.lt.s32.totalorder %s619_s15, 1  ;;  %v225_v0 = vlaneseq  ;;  %v222_v5 = vld [vmem:[%s805_s2] sm:$0xff]  ;;  %vm232_vm0 = vcmask 31744   ;;  %vm245_vm1 = vcmask 1043456   ;;  %v630_v12 = vmov 0.0  }
  0x2b   : > { %v239_v10 = vld [vmem:[%s190_s29] sm:$0xff]  ;;  %314 = vmatprep.mubr.f32.mxu0 %v630_v12  ;;  %s442_s24 = sshll.u32 %s738_s22, 4  ;;  %s452_s11 = sshll.u32 %s619_s15, 8 }
  0x2c   : > { %s217_s30 = scalar_select %p216_p12, %s619_s15, 1  ;;  %v226_v1 = vshrl.u32 %v225_v0, 7  ;;  %v241_v11 = vcombine.high %v239_v10, %v239_v10 }
  0x2d   : > { %s215_s9 = scalar_lea.vmem [#allocation6], %s442_s24  ;;  %s338_s21 = scalar_lea.hbm %s806_s3, %s452_s11 }
  0x2e   : > { %s218_s6 = scalar_lea.vmem %s803_s0, %s217_s30  ;;  %v227_v2 = vsub.s32 0, %v226_v1  ;;  %443 = vmatprep.subr.msk.mxu0 %vm245_vm1, %v241_v11  ;;  %s340_s10 = sshll.u32 %s215_s9, 4  ;;  %s758_s10 = int_to_ptr.vmem [resolvable:$true] %s340_s10 }
  0x2f   : > { %v221_v3 = vld [vmem:[%s218_s6] sm:$0x1]  ;;  %444 = vmatpush1.msk.msra.mxu0 %vm245_vm1, %v239_v10  ;;  %s324_s23 = scalar_lea.sflag [#allocation5], %s738_s22  ;;  %s547_s28 = scalar_lea.vmem %s758_s10, 256 }
  0x30   : > { %v223_v4 = vadd.f32 1.0, %v221_v3  ;;  %p548_p8 = scmp.ne.s32.totalorder %s758_s10, %s547_s28  ;;  %s631_s15 = smov [#allocation6]  }
  0x31   : > { %s551_s29 = sshll.u32 %s631_s15, 4  ;;  %s552_s29 = int_to_ptr.vmem [resolvable:$false] %s551_s29 }
  0x32   : > { %v228_v6 = vrot.slane %v223_v4, %v227_v2  ;;  %p549_p11 = pnand %p548_p8, %p703_p9  ;;  %s553_s30 = scalar_lea.vmem %s552_s29, 512 }
  0x33   : > { %p554_p1 = scmp.lt.s32.totalorder %s758_s10, %s552_s29  ;;  %p555_p2 = scmp.lt.s32.totalorder %s553_s30, %s547_s28 }
  0x34   : > { %v230_v7 = vmul.f32 %v228_v6, %v222_v5  ;;  %p550_p0 = pneg %p549_p11 }
  0x35   : > { %p556_p3 = por %p555_p2, %p554_p1 }
  0x36   : > { %v231_v8 = vmul.f32 %v230_v7, %v230_v7 }
  0x37   : > { %p557_p5 = pnand %p556_p3, %p550_p0 }
  0x38   : > { %v233_v9 = vsel %vm232_vm0, %v231_v8, 0.0 }
  0x39   : > { %234 = vadd.xlane.f32.xlu0 %v233_v9 }
  0xc2   : > { %v235_v13 = vpop.xlane.xlu0 %234 }
  0xc3   : > { %v236_v14 = vadd.f32 1e-08, %v235_v13 }
  0xc5   : > { %517 = vrsqrt.f32 %v236_v14 }
  0xd2   : > { %v518_v15 = vpop.eup %517 }
  0xd3   : > { %v238_v16 = vmul.f32 %v518_v15, %v230_v7 }
  0xd5   : > { %445 = vmatmul.mubr.msk.f32.vlgmr.msra.gmra.mxu0 %vm232_vm0, %v238_v16 }
 0x195   : > { %v316_v17 = vpop.f32.mrf.mxu0 }
 0x196   : > { %321 = vst [vmem:[%s215_s9] sm:$0xff] %v316_v17 }
 0x197   : > { %v318_v18 = vpop.f32.mrf.mxu0 }
 0x198   : > { %322 = vst [vmem:[%s215_s9 + $0x8] sm:$0xff] %v318_v18 }
 0x199   : > { %560 = shalt.err (!%p557_p5)
}
 0x19a   : > { %s561_s4 = scalar_lea.hbm %s338_s21, 256  ;;  %s565_s6 = scalar_lea.hbm %s806_s3, 512 }
 0x19b   : > { %p562_p6 = scmp.ne.s32.totalorder %s338_s21, %s561_s4  ;;  %p566_p4 = scmp.lt.s32.totalorder %s338_s21, %s806_s3 }
 0x19c   : > { %p567_p13 = scmp.lt.s32.totalorder %s565_s6, %s561_s4 }
 0x19d   : > { %p563_p7 = pnand %p562_p6, %p703_p9 }
 0x19e   : > { %p568_p12 = por %p567_p13, %p566_p4 }
 0x19f   : > { %p564_p10 = pneg %p563_p7 }
 0x1a1   : > { %p569_p8 = pnand %p568_p12, %p564_p10 }
 0x1a3   : > { %572 = shalt.err (!%p569_p8)
}
 0x1a4   : > { %455 = dma.vmem_to_hbm [thread:$0]  (%p703_p9), %s758_s10, 256, %s338_s21, %s324_s23  }
 0x1a5 PF: > { %s352_s24 = sand.u32 1, %s607_s12   ;;  %p812_p11 = scmp.ne.s32.totalorder %s810_s27, 0 }
 0x1a6   : > { %p813_p0 = scmp.ge.s32.totalorder %s627_s17, 2  ;;  %s353_s9 = scalar_lea.sflag [#allocation5], %s352_s24 }
 0x1a8   : > { %p462_p1 = pnand %p813_p0, %p812_p11 }
 0x1aa   : > { %p463_p2 = pneg %p462_p1 }
 0x1ac   : > { %602 = dma.done.wait (%p463_p2), %s353_s9, 256  }
 0x1ad   : > { %604 = vsyncadd (%p463_p2), %s353_s9, 4294967040  ;;  %s19_s17 = sadd.s32 1, %s627_s17   ;;  %s814_s12 = smov %s611_s13 }
 0x1ae   : > { %p16_p3 = scmp.ge.s32.totalorder %s19_s17, 4   ;;  %s815_s13 = smov %s615_s14 }
 0x1af   : > { %s816_s14 = smov %s708_s26  ;;  %s817_s15 = smov %s623_s16 }
 0x1b0   : > { %s818_s16 = smov %s820_s20  ;;  %18 = sbr.rel (!%p16_p3) target bundleno = 6 (0x6), region = 80 }
 0x1b5   :  { %358 = vsyncpa [#allocation4], 1 }
 0x1b6   :  { %360 = vsyncpa [#allocation4 + $0x1], 1 }
 0x1b7   :  { %361 = vsyncpa [#allocation5], 1 }
 0x1b8   :  { %363 = vsyncpa [#allocation5 + $0x1], 1 }

</bundles_post_ra>
